<compile_context>
chip_gen: v6e
topology: v6e:2x2x1
jax: 0.10.0
libtpu: 0.0.40
codegen_flags: <defaults>
</compile_context>

<pallas_src>
import numpy as np

import jax
import jax.numpy as jnp
from jax import lax
from jax.experimental import pallas as pl
from jax.experimental.pallas import tpu as pltpu

_MASK_VALUE = -1e30


def _stable_sigmoid(logits):
    # sigmoid without overflow: exp(-|z|) in (0, 1], so no inf is generated
    # even for the -1e30 masked logits.
    z = jnp.exp(-jnp.abs(logits))
    return jnp.where(logits >= 0, 1.0 / (1.0 + z), z / (1.0 + z))


def _hl_kernel_masked(x_ref, w_ref, b_ref, m_ref, o_ref):
    # x_ref: (Tt, D), w_ref: (1, D), b_ref: (1, 1), m_ref: (1, Tt), o_ref: (1, Tt)
    logits = lax.dot_general(
        w_ref[...], x_ref[...],
        dimension_numbers=(((1,), (1,)), ((), ())),   # contract over D
        preferred_element_type=jnp.float32)           # (1, Tt), lane-dense
    logits = logits + b_ref[...]
    logits = jnp.where(m_ref[...] != 0, logits, jnp.float32(_MASK_VALUE))
    o_ref[...] = _stable_sigmoid(logits)


def _hl_kernel_nomask(x_ref, w_ref, b_ref, o_ref):
    logits = lax.dot_general(
        w_ref[...], x_ref[...],
        dimension_numbers=(((1,), (1,)), ((), ())),
        preferred_element_type=jnp.float32)
    logits = logits + b_ref[...]
    o_ref[...] = _stable_sigmoid(logits)


def _pick_row_tile(rows, d, itemsize, target_bytes=2 * 1024 * 1024):
    """Row-tile sized so each grid step DMAs ~target_bytes of x (lane-padded D)."""
    pad_d = max(128, ((d + 127) // 128) * 128)
    t = (target_bytes // (itemsize * pad_d)) // 128 * 128
    t = max(t, 128)
    # Keep >= ~8 grid steps when the problem is big enough (v7x has 2 TCs; a
    # 1-2 step grid would idle one core and collapse prefetch/writeback overlap).
    if rows >= 8 * 128:
        t = min(t, max(128, (rows // (8 * 128)) * 128))
    if rows <= t:
        return rows          # single full-extent block (always layout-legal)
    return t


def highlight_layer(x, weight, bias, mask=None, *, row_tile=None):
    """Pallas implementation of HighLightLayer.forward.

    x:      (B, T, D) array (f32 or bf16; DMA'd in its native dtype)
    weight: Conv1d(dim, 1, 1) weight, any shape with D elements
    bias:   Conv1d bias, scalar / shape (1,)
    mask:   optional (B, T) mask (nonzero = keep, 0 = mask out)

    Returns: (B, T) float32 scores = sigmoid(masked logits).
    """
    B, T, D = x.shape
    rows = B * T

    x2 = jnp.reshape(x, (rows, D))                          # free reshape
    w = jnp.reshape(jnp.asarray(weight), (1, D)).astype(x2.dtype)
    b = jnp.reshape(jnp.asarray(bias), (1, 1)).astype(jnp.float32)

    if row_tile is None:
        row_tile = _pick_row_tile(rows, D, x2.dtype.itemsize)
    grid = (pl.cdiv(rows, row_tile),)

    x_spec = pl.BlockSpec((row_tile, D), lambda i: (i, 0))
    w_spec = pl.BlockSpec((1, D), lambda i: (0, 0))      # VMEM-resident
    b_spec = pl.BlockSpec((1, 1), lambda i: (0, 0))      # VMEM-resident
    out_spec = pl.BlockSpec((1, row_tile), lambda i: (0, i))
    out_shape = jax.ShapeDtypeStruct((1, rows), jnp.float32)

    compiler_params = pltpu.CompilerParams(
        dimension_semantics=("parallel",),
        vmem_limit_bytes=32 * 1024 * 1024)   # above v5e's 16 MiB default, safe on v7x

    bytes_accessed = (rows * D * x2.dtype.itemsize    # x read
                      + rows * 4                      # scores write
                      + D * x2.dtype.itemsize + 4)    # weight + bias

    if mask is not None:
        m = jnp.asarray(mask)
        if m.dtype == jnp.bool_:
            m = m.astype(jnp.float32)
        m2 = jnp.reshape(m, (1, rows))
        m_spec = pl.BlockSpec((1, row_tile), lambda i: (0, i))
        cost = pl.CostEstimate(
            flops=2 * rows * D, transcendentals=rows,
            bytes_accessed=bytes_accessed + rows * m2.dtype.itemsize)
        out = pl.pallas_call(
            _hl_kernel_masked,
            out_shape=out_shape,
            grid=grid,
            in_specs=[x_spec, w_spec, b_spec, m_spec],
            out_specs=out_spec,
            compiler_params=compiler_params,
            cost_estimate=cost,
        )(x2, w, b, m2)
    else:
        cost = pl.CostEstimate(
            flops=2 * rows * D, transcendentals=rows,
            bytes_accessed=bytes_accessed)
        out = pl.pallas_call(
            _hl_kernel_nomask,
            out_shape=out_shape,
            grid=grid,
            in_specs=[x_spec, w_spec, b_spec],
            out_specs=out_spec,
            compiler_params=compiler_params,
            cost_estimate=cost,
        )(x2, w, b)

    return jnp.reshape(out, (B, T))


# ----------------------------- reference / test -----------------------------

def _stable_sigmoid_np(z):
    out = np.empty_like(z)
    pos = z >= 0
    out[pos] = 1.0 / (1.0 + np.exp(-z[pos]))
    ez = np.exp(z[~pos])
    out[~pos] = ez / (1.0 + ez)
    return out


def _reference(x, weight, bias, mask):
    """Pure-numpy re-implementation of the PyTorch forward for validation."""
    x = np.asarray(x, np.float32)
    w = np.asarray(weight, np.float32).reshape(-1)
    b = np.float32(np.asarray(bias).reshape(-1)[0])
    logits = x @ w + b                                  # (B, T)
    if mask is not None:
        m = np.asarray(mask, np.float32)
        logits = logits + (1.0 - m) * np.float32(_MASK_VALUE)
    return _stable_sigmoid_np(logits.astype(np.float64)).astype(np.float32)


if __name__ == "__main__":
    key = jax.random.PRNGKey(0)
    B, T, D = 2, 16, 32   # batch=2, seq=16, hidden dim=32
    k1, k2, k3, k4 = jax.random.split(key, 4)

    x = jax.random.normal(k1, (B, T, D), jnp.float32)
    weight = jax.random.normal(k2, (D,), jnp.float32) * 0.1   # Conv1d(D,1,1) weight
    bias = jax.random.normal(k3, (1,), jnp.float32) * 0.1     # Conv1d bias
    mask = (jax.random.uniform(k4, (B, T)) > 0.25).astype(jnp.float32)

    # masked path (as used in the model)
    scores = jax.block_until_ready(highlight_layer(x, weight, bias, mask))
    ref = _reference(np.asarray(x), np.asarray(weight), np.asarray(bias),
                     np.asarray(mask))
    np.testing.assert_allclose(np.asarray(scores), ref, rtol=1e-5, atol=1e-5)
    assert scores.shape == (B, T)

    # mask=None path
    scores_nm = jax.block_until_ready(highlight_layer(x, weight, bias, None))
    ref_nm = _reference(np.asarray(x), np.asarray(weight), np.asarray(bias), None)
    np.testing.assert_allclose(np.asarray(scores_nm), ref_nm,
                               rtol=1e-5, atol=1e-5)

    # slightly larger shape exercising the tiled (multi-step grid) path
    B2, T2 = 4, 256                                    # rows = 1024 -> 8 steps
    x_big = jax.random.normal(k1, (B2, T2, D), jnp.float32)
    mask_big = (jax.random.uniform(k4, (B2, T2)) > 0.5).astype(jnp.float32)
    scores_big = jax.block_until_ready(
        highlight_layer(x_big, weight, bias, mask_big))
    ref_big = _reference(np.asarray(x_big), np.asarray(weight),
                         np.asarray(bias), np.asarray(mask_big))
    np.testing.assert_allclose(np.asarray(scores_big), ref_big,
                               rtol=1e-5, atol=1e-5)

    print("KERNEL_OK")
</pallas_src>

<mosaic_0001>
module attributes {stable_mosaic.version = 11 : i64} {
  func.func @_hl_kernel_masked(%arg0: i32, %arg1: memref<32x32xf32, #tpu.memory_space<vmem>>, %arg2: memref<1x32xf32, #tpu.memory_space<vmem>>, %arg3: memref<1x1xf32, #tpu.memory_space<vmem>>, %arg4: memref<1x32xf32, #tpu.memory_space<vmem>>, %arg5: memref<1x32xf32, #tpu.memory_space<vmem>>) attributes {dimension_semantics = [#tpu.dimension_semantics<parallel>], iteration_bounds = array<i64: 1>, scalar_prefetch = 0 : i64, scratch_operands = 0 : i64, tpu.core_type = #tpu.core_type<tc>, window_params = [{transform_indices = @transform_0, window_bounds = array<i64: 32, 32>}, {pipeline_mode = #tpu.pipeline_mode<synchronous>, transform_indices = @transform_1, window_bounds = array<i64: 1, 32>}, {pipeline_mode = #tpu.pipeline_mode<synchronous>, transform_indices = @transform_2, window_bounds = array<i64: 1, 1>}, {transform_indices = @transform_3, window_bounds = array<i64: 1, 32>}, {transform_indices = @transform_4, window_bounds = array<i64: 1, 32>}]} {
    %c0 = arith.constant 0 : index
    %c0_0 = arith.constant 0 : index
    %0 = vector.load %arg2[%c0, %c0_0] : memref<1x32xf32, #tpu.memory_space<vmem>>, vector<1x32xf32>
    %c0_1 = arith.constant 0 : index
    %c0_2 = arith.constant 0 : index
    %1 = vector.load %arg1[%c0_1, %c0_2] : memref<32x32xf32, #tpu.memory_space<vmem>>, vector<32x32xf32>
    %cst = arith.constant dense<0.000000e+00> : vector<1x32xf32>
    %2 = tpu.matmul %0, %1, %cst {dimension_numbers = #tpu.dot_dimension_numbers<[1], [1], [0], [0], [0, 0, 1, 0], [], []>} : vector<1x32xf32>, vector<32x32xf32>, vector<1x32xf32> -> vector<1x32xf32>
    %c0_3 = arith.constant 0 : index
    %c0_4 = arith.constant 0 : index
    %3 = vector.load %arg3[%c0_3, %c0_4] : memref<1x1xf32, #tpu.memory_space<vmem>>, vector<1x1xf32>
    %4 = vector.broadcast %3 : vector<1x1xf32> to vector<1x32xf32>
    %5 = arith.addf %2, %4 : vector<1x32xf32>
    %c0_5 = arith.constant 0 : index
    %c0_6 = arith.constant 0 : index
    %6 = vector.load %arg4[%c0_5, %c0_6] : memref<1x32xf32, #tpu.memory_space<vmem>>, vector<1x32xf32>
    %cst_7 = arith.constant 0.000000e+00 : f32
    %7 = vector.broadcast %cst_7 : f32 to vector<1x32xf32>
    %8 = arith.cmpf one, %6, %7 : vector<1x32xf32>
    %cst_8 = arith.constant -1.000000e+30 : f32
    %9 = vector.broadcast %cst_8 : f32 to vector<1x32xf32>
    %10 = arith.select %8, %5, %9 : vector<1x32xi1>, vector<1x32xf32>
    %11 = math.absf %10 : vector<1x32xf32>
    %cst_9 = arith.constant 0.000000e+00 : f32
    %12 = vector.broadcast %cst_9 : f32 to vector<1x32xf32>
    %13 = arith.subf %12, %11 : vector<1x32xf32>
    %14 = math.exp %13 : vector<1x32xf32>
    %cst_10 = arith.constant 0.000000e+00 : f32
    %15 = vector.broadcast %cst_10 : f32 to vector<1x32xf32>
    %16 = arith.cmpf oge, %10, %15 : vector<1x32xf32>
    %cst_11 = arith.constant 1.000000e+00 : f32
    %17 = vector.broadcast %cst_11 : f32 to vector<1x32xf32>
    %18 = arith.addf %17, %14 : vector<1x32xf32>
    %cst_12 = arith.constant 1.000000e+00 : f32
    %19 = vector.broadcast %cst_12 : f32 to vector<1x32xf32>
    %20 = arith.divf %19, %18 : vector<1x32xf32>
    %cst_13 = arith.constant 1.000000e+00 : f32
    %21 = vector.broadcast %cst_13 : f32 to vector<1x32xf32>
    %22 = arith.addf %21, %14 : vector<1x32xf32>
    %23 = arith.divf %14, %22 : vector<1x32xf32>
    %24 = arith.select %16, %20, %23 : vector<1x32xi1>, vector<1x32xf32>
    %c0_14 = arith.constant 0 : index
    %c0_15 = arith.constant 0 : index
    %25 = vector.load %arg5[%c0_14, %c0_15] : memref<1x32xf32, #tpu.memory_space<vmem>>, vector<1x32xf32>
    tpu.vector_store %arg5[%c0_14, %c0_15], %24 {strides = array<i32>} : memref<1x32xf32, #tpu.memory_space<vmem>>, vector<1x32xf32>,
    return
  }
  func.func @transform_0(%arg0: i32) -> (i32, i32) {
    %c0_i32 = arith.constant 0 : i32
    %c0_i32_0 = arith.constant 0 : i32
    return %arg0, %c0_i32 : i32, i32
  }
  func.func @transform_1(%arg0: i32) -> (i32, i32) {
    %c0_i32 = arith.constant 0 : i32
    %c0_i32_0 = arith.constant 0 : i32
    %c0_i32_1 = arith.constant 0 : i32
    return %c0_i32, %c0_i32_0 : i32, i32
  }
  func.func @transform_2(%arg0: i32) -> (i32, i32) {
    %c0_i32 = arith.constant 0 : i32
    %c0_i32_0 = arith.constant 0 : i32
    %c0_i32_1 = arith.constant 0 : i32
    return %c0_i32, %c0_i32_0 : i32, i32
  }
  func.func @transform_3(%arg0: i32) -> (i32, i32) {
    %c0_i32 = arith.constant 0 : i32
    %c0_i32_0 = arith.constant 0 : i32
    return %c0_i32, %arg0 : i32, i32
  }
  func.func @transform_4(%arg0: i32) -> (i32, i32) {
    %c0_i32 = arith.constant 0 : i32
    %c0_i32_0 = arith.constant 0 : i32
    return %c0_i32, %arg0 : i32, i32
  }
}

</mosaic_0001>

<bundles_post_ra>
// kernel: tpu_custom_call.1
= control target key start
LH: loop header
LB: loop body
LE: loop exit
PB: predicated region body
PF: predicated region fallthrough
CT: control target
= control target key end

     0   :  { %s289_s0 = inlined_call_operand.hbm [shape: f32[32,32], index: 0, kind: input, shape index: {}]   ;;  %s290_s1 = inlined_call_operand.vmem [shape: f32[1,32], index: 1, kind: input, shape index: {}]   ;;  %s291_s2 = inlined_call_operand.<no memory space> [shape: f32[1,1], index: 2, kind: input, shape index: {}]   ;;  %s292_s3 = inlined_call_operand.vmem [shape: f32[1,32], index: 3, kind: input, shape index: {}]   ;;  %s293_s4 = inlined_call_operand.hbm [shape: f32[1,32], index: 4, kind: output, shape index: {}]  }
   0x1   :  { %v9_v0 = vstv %s291_s2 }
   0x2   :  { %10 = vst [vmem:[#allocation2] sm:$0x1] %v9_v0 }
   0x3   :  { %11 = vsyncpa [#allocation4], 0 }
   0x4   :  { %12 = vsyncpa [#allocation5], 0  ;;  %s242_s17 = smov [#allocation3]  }
   0x5   :  { %s18_s18 = sshll.u32 %s242_s17, 4  ;;  %s19_s18 = int_to_ptr.vmem [resolvable:$true] %s18_s18 }
   0x6   :  { %s206_s19 = scalar_lea.vmem %s19_s18, 512  ;;  %p211_p1 = scmp.lt.s32.totalorder %s19_s18, %s19_s18 }
   0x7   :  { %p207_p0 = scmp.ne.s32.totalorder %s19_s18, %s206_s19  ;;  %p212_p2 = scmp.lt.s32.totalorder %s206_s19, %s206_s19 }
   0x9   :  { %p213_p3 = por %p212_p2, %p211_p1 }
   0xb   :  { %p214_p4 = pnand %p213_p3, %p207_p0 }
   0xd   :  { %217 = shalt.err (!%p214_p4)
}
   0xe   :  { %s243_s20 = smov 128   ;;  %s244_s21 = smov 8  }
   0xf   :  { %24 = dma.hbm_to_vmem [thread:$0]  %s289_s0, 512, %s19_s18, [#allocation4], %s243_s20, %s243_s20, %s244_s21  }
  0x10   :  { %238 = dma.done.wait [#allocation4], 512  }
  0x11   :  { %239 = vsyncadd [#allocation4], 4294966784  ;;  %v245_v1 = vmov 0.0   ;;  %vm246_vm0 = vmmov 0   ;;  %v247_v2 = vmov 0   ;;  %vm49_vm1 = vcmask 261120  }
  0x12   :  { %175 = vmatprep.subr.mxu0 %v245_v1  ;;  %183 = vmatprep.mubr.msk.f32.mxu0 %vm246_vm0, %v245_v1  ;;  %v38_v3 = vld [vmem:[#allocation3 + $0x18] sm:$0xff]  ;;  %v37_v5 = vld [vmem:[#allocation3 + $0x10] sm:$0xff]  ;;  %v36_v6 = vld [vmem:[#allocation3 + $0x8] sm:$0xff]  ;;  %v45_v9 = vlaneseq  ;;  %vm148_vm3 = vcmask 253952  }
  0x13   :  { %193 = vset.pattern.permute.xlu0 %v247_v2  ;;  %176 = vmatpush3.xpose.msk.msra.mxu0 %vm49_vm1, %v38_v3  ;;  %v39_v4 = vld [vmem:[#allocation2] sm:$0x1]  ;;  %v35_v7 = vld [vmem:[#allocation3] sm:$0xff] }
  0x14   :  { %177 = vmatprep.subr.mxu0 %v245_v1  ;;  %42 = vperm.xlu0 %193, %v39_v4   ;;  %v34_v8 = vld [vmem:[%s290_s1] sm:$0x1]  ;;  %v46_v10 = vshrl.u32 %v45_v9, 7  ;;  %s248_s1 = smov [#allocation6]  }
  0x15   :  { %v135_v14 = vld [vmem:[%s292_s3] sm:$0x1]  ;;  %s156_s26 = sshll.u32 %s248_s1, 4  ;;  %s157_s26 = int_to_ptr.vmem [resolvable:$true] %s156_s26 }
  0x16   :  { %v47_v11 = vsub.s32 0, %v46_v10  ;;  %vm136_vm2 = vcmp.ne.f32.partialorder %v135_v14, 0.0  ;;  %s218_s3 = scalar_lea.vmem %s157_s26, 16  ;;  %s222_s27 = scalar_lea.vmem %s157_s26, 32 }
  0x17   :  { %178 = vmatpush3.xpose.msk.msra.mxu0 %vm49_vm1, %v37_v5  ;;  %p219_p5 = scmp.ne.s32.totalorder %s157_s26, %s218_s3  ;;  %p223_p6 = scmp.lt.s32.totalorder %s157_s26, %s157_s26 }
  0x18   :  { %179 = vmatprep.subr.mxu0 %v245_v1  ;;  %p224_p7 = scmp.lt.s32.totalorder %s222_s27, %s218_s3 }
  0x1a   :  { %p225_p8 = por %p224_p7, %p223_p6 }
  0x1b   :  { %180 = vmatpush3.xpose.msk.msra.mxu0 %vm49_vm1, %v36_v6 }
  0x1c   :  { %181 = vmatprep.subr.mxu0 %v245_v1  ;;  %p226_p9 = pnand %p225_p8, %p219_p5 }
  0x1f   :  { %182 = vmatpush3.xpose.msk.msra.mxu0 %vm49_vm1, %v35_v7 }
  0x22   :  { %184 = vmatmul.mubr.msk.f32.vlgmr.msra.gmra.mxu0 %vm49_vm1, %v34_v8 }
  0x8f   :  { %v43_v12 = vpop.permute.xlu0 %42 }
  0x90   :  { %v48_v13 = vrot.slane %v43_v12, %v47_v11 }
  0xe2   :  { %v131_v15 = vpop.f32.mrf.mxu0 }
  0xe3   :  { %v132_v16 = vadd.f32 %v131_v15, %v48_v13 }
  0xe4   :  { %v185_v17 = vpop.f32.mrf.mxu0 }
  0xe5   :  { %v137_v18 = vsel %vm136_vm2, %v132_v16, -1e+30 }
  0xe6   :  { %v138_v19 = vand.u32 2147483647, %v137_v18  ;;  %vm142_vm4 = vcmp.ge.f32.partialorder %v137_v18, 0.0 }
  0xe8   :  { %v139_v20 = vsub.f32 0.0, %v138_v19 }
  0xea   :  { %v140_v21 = vmul.f32 1.442695, %v139_v20 }
  0xec   :  { %194 = vpow2.f32 %v140_v21 }
  0xf9   :  { %v195_v22 = vpop.eup %194 }
  0xfa   :  { %v143_v23 = vadd.f32 1.0, %v195_v22 }
  0xfc   :  { %196 = vrcp.f32 %v143_v23 }
 0x109   :  { %v197_v24 = vpop.eup %196 }
 0x10a   :  { %v146_v25 = vmul.f32 %v197_v24, %v195_v22 }
 0x10c   :  { %v147_v26 = vsel %vm142_vm4, %v197_v24, %v146_v25 }
 0x10d   :  { %149 = vst.msk [vmem:[#allocation6] sm:$0x1] %vm148_vm3, %v147_v26 }
 0x10e   :  { %229 = shalt.err (!%p226_p9)
}
 0x10f   :  { %159 = dma.vmem_to_hbm [thread:$0]  %s157_s26, 16, %s293_s4, [#allocation5]  }
 0x110   :  { %240 = dma.done.wait [#allocation5], 16  }
 0x111   :  { %241 = vsyncadd [#allocation5], 4294967280 }
 0x112   :  { %163 = vsyncpa [#allocation4], 1 }
 0x113   :  { %164 = vsyncpa [#allocation5], 1 }

</bundles_post_ra>
